<compile_context>
chip_gen: v5e
topology: v5e:2x2
jax: 0.10.0
libtpu: 0.0.40
codegen_flags: <defaults>
</compile_context>

<pallas_src>
import jax
import jax.numpy as jnp
from jax.experimental import pallas as pl
from jax.experimental.pallas import tpu as pltpu


_LANE = 128
_NEG_PAD = -1e9                          # bias padding for label columns beyond the real L
_HIDDEN_TILE_BUDGET = 4 * 1024 * 1024    # bytes per pipeline buffer of the hidden input
                                         # (x2 double-buffered -> well under v5e's 16 MiB
                                         #  scoped default and v7x's 32 MiB default)


def _clas_head_kernel(hidden_ref, mask_ref, w_ref, b_ref,
                      logits_ref, softmax_ref, sigmoid_ref,
                      acc_ref, msum_ref):
    """grid = (B//b_tile [parallel], S//s_tile [arbitrary, reduction])."""
    s_idx = pl.program_id(1)

    # ---- init accumulators at the start of the sequence reduction -----------------------
    @pl.when(s_idx == 0)
    def _():
        acc_ref[...] = jnp.zeros_like(acc_ref)
        msum_ref[...] = jnp.zeros_like(msum_ref)

    # ---- masked partial sum for this (batch, sequence) tile ------------------------------
    h = hidden_ref[...].astype(jnp.float32)          # [Bt, St, H]  (bf16 in HBM)
    m = mask_ref[...].astype(jnp.float32)            # [Bt, St, 1]  (pre-shaped in wrapper)
    m = jnp.where(m < 0.0, 0.0, m)                   # input_mask_expanded[< 0] = 0
    acc_ref[...] += jnp.sum(h * m, axis=1)           # [Bt, H]   f32 accumulation
    msum_ref[...] += jnp.sum(m, axis=1)              # [Bt, 1]

    # ---- finalize on the last sequence tile ----------------------------------------------
    @pl.when(s_idx == pl.num_programs(1) - 1)
    def _():
        inv_cnt = pl.reciprocal(jnp.maximum(msum_ref[...], 1e-9), approx=True)
        pooled = acc_ref[...] * inv_cnt              # mean pooling, [Bt, H]
        # dropout(p=0.1) is identity at eval time.
        # TODO(synk): training-mode dropout (random mask + 1/(1-p) scaling) not modeled.
        logits = jnp.dot(pooled, w_ref[...],
                         preferred_element_type=jnp.float32) + b_ref[...]   # [Bt, Lpad]
        logits_ref[...] = logits                     # lane-dense (128-wide) store

        mx = jnp.max(logits, axis=1, keepdims=True)
        e = jnp.exp(logits - mx)                     # padded cols: exp(-1e9 - mx) == 0
        softmax_ref[...] = e * pl.reciprocal(jnp.sum(e, axis=1, keepdims=True), approx=True)

        neg = jnp.exp(jnp.minimum(-logits, 60.0))    # clamp keeps padded cols finite
        sigmoid_ref[...] = pl.reciprocal(1.0 + neg, approx=True)


def _pick_tiles(B, S, H, itemsize):
    """Sublane-aligned batch tile + largest seq tile (mult of 8, divisor of S) in budget."""
    b_tile = 8 if (B % 8 == 0) else B
    max_s = max(8, _HIDDEN_TILE_BUDGET // max(1, b_tile * H * itemsize))
    s_tile = S                                       # fallback: full-extent escape hatch
    best = 0
    t = 8
    lim = min(S, max_s)
    while t <= lim:
        if S % t == 0:
            best = t
        t += 8
    if best:
        s_tile = best
    return b_tile, s_tile


def clas_forward(hidden, mask, weight, bias, *, b_tile=None, s_tile=None):
    """Classification head (eval path).

    hidden: [B, S, H]  hidden states (bf16 recommended: the kernel is HBM-bandwidth bound)
    mask:   [B, S]     attention mask (values < 0 treated as 0, as in mean_pooling)
    weight: [H, L]     classifier weight (transpose of torch nn.Linear.weight)
    bias:   [L]
    Returns (logits, softmax_probs, sigmoid_probs), each [B, L] float32.
    """
    B, S, H = hidden.shape
    L = weight.shape[1]
    L_pad = max(_LANE, ((L + _LANE - 1) // _LANE) * _LANE)

    auto_b, auto_s = _pick_tiles(B, S, H, jnp.dtype(hidden.dtype).itemsize)
    b_tile = auto_b if b_tile is None else b_tile
    s_tile = auto_s if s_tile is None else s_tile
    assert B % b_tile == 0 and S % s_tile == 0, (B, S, b_tile, s_tile)

    # Wrapper-side layout plumbing (free): [B,S,1] mask, lane-padded (128) classifier.
    mask3 = mask.astype(jnp.float32).reshape(B, S, 1)
    w_pad = jnp.zeros((H, L_pad), jnp.float32).at[:, :L].set(weight.astype(jnp.float32))
    b_pad = jnp.full((1, L_pad), _NEG_PAD, jnp.float32).at[0, :L].set(bias.astype(jnp.float32))

    grid = (B // b_tile, S // s_tile)
    out_shape = (
        jax.ShapeDtypeStruct((B, L_pad), jnp.float32),   # logits
        jax.ShapeDtypeStruct((B, L_pad), jnp.float32),   # softmax probs (single-label tasks)
        jax.ShapeDtypeStruct((B, L_pad), jnp.float32),   # sigmoid probs (multi_label tasks)
    )

    logits_p, sm_p, sg_p = pl.pallas_call(
        _clas_head_kernel,
        out_shape=out_shape,
        grid_spec=pltpu.PrefetchScalarGridSpec(
            num_scalar_prefetch=0,
            grid=grid,
            in_specs=[
                pl.BlockSpec((b_tile, s_tile, H), lambda b, s: (b, s, 0)),   # hidden (bf16)
                pl.BlockSpec((b_tile, s_tile, 1), lambda b, s: (b, s, 0)),   # mask [B,S,1]
                pl.BlockSpec((H, L_pad), lambda b, s: (0, 0)),               # weight (resident)
                pl.BlockSpec((1, L_pad), lambda b, s: (0, 0)),               # bias (resident)
            ],
            out_specs=(
                pl.BlockSpec((b_tile, L_pad), lambda b, s: (b, 0)),
                pl.BlockSpec((b_tile, L_pad), lambda b, s: (b, 0)),
                pl.BlockSpec((b_tile, L_pad), lambda b, s: (b, 0)),
            ),
            scratch_shapes=[
                pltpu.VMEM((b_tile, H), jnp.float32),    # pooled-sum accumulator
                pltpu.VMEM((b_tile, 1), jnp.float32),    # mask-count accumulator
            ],
        ),
        compiler_params=pltpu.CompilerParams(
            dimension_semantics=("parallel", "arbitrary")),
    )(hidden, mask3, w_pad, b_pad)

    return logits_p[:, :L], sm_p[:, :L], sg_p[:, :L]


def _reference(hidden, mask, weight, bias):
    h = hidden.astype(jnp.float32)
    m = jnp.where(mask < 0.0, 0.0, mask.astype(jnp.float32))
    pooled = jnp.sum(h * m[:, :, None], axis=1) / jnp.maximum(
        jnp.sum(m, axis=1, keepdims=True), 1e-9)
    logits = pooled @ weight + bias[None, :]
    return logits, jax.nn.softmax(logits, axis=-1), jax.nn.sigmoid(logits)


if __name__ == "__main__":
    # Small shapes consistent with the forward pass (batch, seq len, hidden_size, labels).
    B, S, H, L = 16, 64, 128, 4

    key = jax.random.PRNGKey(0)
    k_h, k_w, k_b = jax.random.split(key, 3)

    # Hidden states streamed in bf16 (as the pretrained encoder would emit / be cast to).
    hidden = jax.random.normal(k_h, (B, S, H), dtype=jnp.float32).astype(jnp.bfloat16)

    # Varied valid lengths per example; one negative entry exercises the "<0 -> 0" clamp.
    lengths = S - 3 * (jnp.arange(B) % 5)
    mask = (jnp.arange(S)[None, :] < lengths[:, None]).astype(jnp.float32)
    mask = mask.at[0, 1].set(-1.0)

    # Deterministic classifier params (nn.Linear(hidden_size, len(labels))).
    weight = jax.random.normal(k_w, (H, L), dtype=jnp.float32) * 0.05
    bias = jax.random.normal(k_b, (L,), dtype=jnp.float32) * 0.05

    # s_tile=16 -> grid = (2, 4): exercises both the parallel batch axis and the
    # sequence-reduction accumulator path.
    logits, probs_softmax, probs_sigmoid = clas_forward(
        hidden, mask, weight, bias, s_tile=16)
    jax.block_until_ready((logits, probs_softmax, probs_sigmoid))

    ref_logits, ref_sm, ref_sg = _reference(hidden, mask, weight, bias)
    assert jnp.allclose(logits, ref_logits, atol=5e-3, rtol=1e-2), \
        float(jnp.max(jnp.abs(logits - ref_logits)))
    assert jnp.allclose(probs_softmax, ref_sm, atol=5e-3, rtol=1e-2), \
        float(jnp.max(jnp.abs(probs_softmax - ref_sm)))
    assert jnp.allclose(probs_sigmoid, ref_sg, atol=5e-3, rtol=1e-2), \
        float(jnp.max(jnp.abs(probs_sigmoid - ref_sg)))

    # TODO(synk): FocalLoss / BCEFocalLoss are external, undefined classes in the source
    # module; training-mode loss accumulation is not reproduced here.

    print("KERNEL_OK")
</pallas_src>

<mosaic_0001>
module attributes {stable_mosaic.version = 11 : i64} {
  func.func @_clas_head_kernel(%arg0: i32, %arg1: i32, %arg2: memref<8x16x128xbf16, #tpu.memory_space<vmem>>, %arg3: memref<8x16x1xf32, #tpu.memory_space<vmem>>, %arg4: memref<128x128xf32, #tpu.memory_space<vmem>>, %arg5: memref<1x128xf32, #tpu.memory_space<vmem>>, %arg6: memref<8x128xf32, #tpu.memory_space<vmem>>, %arg7: memref<8x128xf32, #tpu.memory_space<vmem>>, %arg8: memref<8x128xf32, #tpu.memory_space<vmem>>, %arg9: memref<8x128xf32, #tpu.memory_space<vmem>>, %arg10: memref<8x1xf32, #tpu.memory_space<vmem>>) attributes {dimension_semantics = [#tpu.dimension_semantics<parallel>, #tpu.dimension_semantics<arbitrary>], iteration_bounds = array<i64: 2, 4>, scalar_prefetch = 0 : i64, scratch_operands = 2 : i64, tpu.core_type = #tpu.core_type<tc>, window_params = [{transform_indices = @transform_0, window_bounds = array<i64: 8, 16, 128>}, {transform_indices = @transform_1, window_bounds = array<i64: 8, 16, 1>}, {pipeline_mode = #tpu.pipeline_mode<synchronous>, transform_indices = @transform_2, window_bounds = array<i64: 128, 128>}, {pipeline_mode = #tpu.pipeline_mode<synchronous>, transform_indices = @transform_3, window_bounds = array<i64: 1, 128>}, {transform_indices = @transform_4, window_bounds = array<i64: 8, 128>}, {transform_indices = @transform_5, window_bounds = array<i64: 8, 128>}, {transform_indices = @transform_6, window_bounds = array<i64: 8, 128>}]} {
    %c0_i32 = arith.constant 0 : i32
    %0 = arith.cmpi eq, %arg1, %c0_i32 : i32
    %1 = arith.extui %0 : i1 to i32
    %c0_i32_0 = arith.constant 0 : i32
    %2 = arith.cmpi ne, %1, %c0_i32_0 : i32
    scf.if %2 {
      %cst_18 = arith.constant 0.000000e+00 : f32
      %23 = vector.broadcast %cst_18 : f32 to vector<8x128xf32>
      %c0_19 = arith.constant 0 : index
      %c0_20 = arith.constant 0 : index
      %24 = vector.load %arg9[%c0_19, %c0_20] : memref<8x128xf32, #tpu.memory_space<vmem>>, vector<8x128xf32>
      tpu.vector_store %arg9[%c0_19, %c0_20], %23 {strides = array<i32>} : memref<8x128xf32, #tpu.memory_space<vmem>>, vector<8x128xf32>,
      %cst_21 = arith.constant 0.000000e+00 : f32
      %25 = vector.broadcast %cst_21 : f32 to vector<8x1xf32>
      %c0_22 = arith.constant 0 : index
      %c0_23 = arith.constant 0 : index
      %26 = vector.load %arg10[%c0_22, %c0_23] : memref<8x1xf32, #tpu.memory_space<vmem>>, vector<8x1xf32>
      tpu.vector_store %arg10[%c0_22, %c0_23], %25 {strides = array<i32>} : memref<8x1xf32, #tpu.memory_space<vmem>>, vector<8x1xf32>,
    } else {
    }
    %c0 = arith.constant 0 : index
    %c0_1 = arith.constant 0 : index
    %c0_2 = arith.constant 0 : index
    %3 = vector.load %arg2[%c0, %c0_1, %c0_2] : memref<8x16x128xbf16, #tpu.memory_space<vmem>>, vector<8x16x128xbf16>
    %4 = arith.extf %3 : vector<8x16x128xbf16> to vector<8x16x128xf32>
    %c0_3 = arith.constant 0 : index
    %c0_4 = arith.constant 0 : index
    %c0_5 = arith.constant 0 : index
    %5 = vector.load %arg3[%c0_3, %c0_4, %c0_5] : memref<8x16x1xf32, #tpu.memory_space<vmem>>, vector<8x16x1xf32>
    %cst = arith.constant 0.000000e+00 : f32
    %6 = vector.broadcast %cst : f32 to vector<8x16x1xf32>
    %7 = arith.cmpf olt, %5, %6 : vector<8x16x1xf32>
    %cst_6 = arith.constant 0.000000e+00 : f32
    %8 = vector.broadcast %cst_6 : f32 to vector<8x16x1xf32>
    %9 = arith.select %7, %8, %5 : vector<8x16x1xi1>, vector<8x16x1xf32>
    %c0_7 = arith.constant 0 : index
    %c0_8 = arith.constant 0 : index
    %10 = vector.load %arg9[%c0_7, %c0_8] : memref<8x128xf32, #tpu.memory_space<vmem>>, vector<8x128xf32>
    %11 = vector.broadcast %9 : vector<8x16x1xf32> to vector<8x16x128xf32>
    %12 = arith.mulf %4, %11 : vector<8x16x128xf32>
    %cst_9 = arith.constant dense<0.000000e+00> : vector<8x128xf32>
    %13 = vector.multi_reduction <add>, %12, %cst_9 [1] : vector<8x16x128xf32> to vector<8x128xf32>
    %14 = arith.addf %10, %13 : vector<8x128xf32>
    %c0_10 = arith.constant 0 : index
    %c0_11 = arith.constant 0 : index
    %15 = vector.load %arg9[%c0_10, %c0_11] : memref<8x128xf32, #tpu.memory_space<vmem>>, vector<8x128xf32>
    tpu.vector_store %arg9[%c0_10, %c0_11], %14 {strides = array<i32>} : memref<8x128xf32, #tpu.memory_space<vmem>>, vector<8x128xf32>,
    %c0_12 = arith.constant 0 : index
    %c0_13 = arith.constant 0 : index
    %16 = vector.load %arg10[%c0_12, %c0_13] : memref<8x1xf32, #tpu.memory_space<vmem>>, vector<8x1xf32>
    %cst_14 = arith.constant dense<0.000000e+00> : vector<8x1xf32>
    %17 = vector.multi_reduction <add>, %9, %cst_14 [1] : vector<8x16x1xf32> to vector<8x1xf32>
    %18 = arith.addf %16, %17 : vector<8x1xf32>
    %c0_15 = arith.constant 0 : index
    %c0_16 = arith.constant 0 : index
    %19 = vector.load %arg10[%c0_15, %c0_16] : memref<8x1xf32, #tpu.memory_space<vmem>>, vector<8x1xf32>
    tpu.vector_store %arg10[%c0_15, %c0_16], %18 {strides = array<i32>} : memref<8x1xf32, #tpu.memory_space<vmem>>, vector<8x1xf32>,
    %c3_i32 = arith.constant 3 : i32
    %20 = arith.cmpi eq, %arg1, %c3_i32 : i32
    %21 = arith.extui %20 : i1 to i32
    %c0_i32_17 = arith.constant 0 : i32
    %22 = arith.cmpi ne, %21, %c0_i32_17 : i32
    scf.if %22 {
      %c0_18 = arith.constant 0 : index
      %c0_19 = arith.constant 0 : index
      %23 = vector.load %arg10[%c0_18, %c0_19] : memref<8x1xf32, #tpu.memory_space<vmem>>, vector<8x1xf32>
      %cst_20 = arith.constant 9.99999971E-10 : f32
      %24 = vector.broadcast %cst_20 : f32 to vector<8x1xf32>
      %25 = arith.maximumf %23, %24 : vector<8x1xf32>
      %26 = tpu.reciprocal %25 {approx = true} : vector<8x1xf32> -> vector<8x1xf32>
      %c0_21 = arith.constant 0 : index
      %c0_22 = arith.constant 0 : index
      %27 = vector.load %arg9[%c0_21, %c0_22] : memref<8x128xf32, #tpu.memory_space<vmem>>, vector<8x128xf32>
      %28 = vector.broadcast %26 : vector<8x1xf32> to vector<8x128xf32>
      %29 = arith.mulf %27, %28 : vector<8x128xf32>
      %c0_23 = arith.constant 0 : index
      %c0_24 = arith.constant 0 : index
      %30 = vector.load %arg4[%c0_23, %c0_24] : memref<128x128xf32, #tpu.memory_space<vmem>>, vector<128x128xf32>
      %cst_25 = arith.constant dense<0.000000e+00> : vector<8x128xf32>
      %31 = tpu.matmul %29, %30, %cst_25 {dimension_numbers = #tpu.dot_dimension_numbers<[1], [0], [0], [1], [0, 0, 1, 1], [], []>} : vector<8x128xf32>, vector<128x128xf32>, vector<8x128xf32> -> vector<8x128xf32>
      %c0_26 = arith.constant 0 : index
      %c0_27 = arith.constant 0 : index
      %32 = vector.load %arg5[%c0_26, %c0_27] : memref<1x128xf32, #tpu.memory_space<vmem>>, vector<1x128xf32>
      %33 = vector.broadcast %32 : vector<1x128xf32> to vector<8x128xf32>
      %34 = arith.addf %31, %33 : vector<8x128xf32>
      %c0_28 = arith.constant 0 : index
      %c0_29 = arith.constant 0 : index
      %35 = vector.load %arg6[%c0_28, %c0_29] : memref<8x128xf32, #tpu.memory_space<vmem>>, vector<8x128xf32>
      tpu.vector_store %arg6[%c0_28, %c0_29], %34 {strides = array<i32>} : memref<8x128xf32, #tpu.memory_space<vmem>>, vector<8x128xf32>,
      %cst_30 = arith.constant dense<0xFF800000> : vector<8xf32>
      %36 = vector.multi_reduction <maximumf>, %34, %cst_30 [1] : vector<8x128xf32> to vector<8xf32>
      %37 = vector.shape_cast %36 : vector<8xf32> to vector<8x1xf32>
      %38 = vector.broadcast %37 : vector<8x1xf32> to vector<8x128xf32>
      %39 = arith.subf %34, %38 : vector<8x128xf32>
      %40 = math.exp %39 : vector<8x128xf32>
      %cst_31 = arith.constant dense<0.000000e+00> : vector<8xf32>
      %41 = vector.multi_reduction <add>, %40, %cst_31 [1] : vector<8x128xf32> to vector<8xf32>
      %42 = vector.shape_cast %41 : vector<8xf32> to vector<8x1xf32>
      %43 = tpu.reciprocal %42 {approx = true} : vector<8x1xf32> -> vector<8x1xf32>
      %44 = vector.broadcast %43 : vector<8x1xf32> to vector<8x128xf32>
      %45 = arith.mulf %40, %44 : vector<8x128xf32>
      %c0_32 = arith.constant 0 : index
      %c0_33 = arith.constant 0 : index
      %46 = vector.load %arg7[%c0_32, %c0_33] : memref<8x128xf32, #tpu.memory_space<vmem>>, vector<8x128xf32>
      tpu.vector_store %arg7[%c0_32, %c0_33], %45 {strides = array<i32>} : memref<8x128xf32, #tpu.memory_space<vmem>>, vector<8x128xf32>,
      %cst_34 = arith.constant 0.000000e+00 : f32
      %47 = vector.broadcast %cst_34 : f32 to vector<8x128xf32>
      %48 = arith.subf %47, %34 : vector<8x128xf32>
      %cst_35 = arith.constant 6.000000e+01 : f32
      %49 = vector.broadcast %cst_35 : f32 to vector<8x128xf32>
      %50 = arith.minimumf %48, %49 : vector<8x128xf32>
      %51 = math.exp %50 : vector<8x128xf32>
      %cst_36 = arith.constant 1.000000e+00 : f32
      %52 = vector.broadcast %cst_36 : f32 to vector<8x128xf32>
      %53 = arith.addf %52, %51 : vector<8x128xf32>
      %54 = tpu.reciprocal %53 {approx = true} : vector<8x128xf32> -> vector<8x128xf32>
      %c0_37 = arith.constant 0 : index
      %c0_38 = arith.constant 0 : index
      %55 = vector.load %arg8[%c0_37, %c0_38] : memref<8x128xf32, #tpu.memory_space<vmem>>, vector<8x128xf32>
      tpu.vector_store %arg8[%c0_37, %c0_38], %54 {strides = array<i32>} : memref<8x128xf32, #tpu.memory_space<vmem>>, vector<8x128xf32>,
    } else {
    }
    return
  }
  func.func @transform_0(%arg0: i32, %arg1: i32) -> (i32, i32, i32) {
    %c0_i32 = arith.constant 0 : i32
    %c0_i32_0 = arith.constant 0 : i32
    return %arg0, %arg1, %c0_i32 : i32, i32, i32
  }
  func.func @transform_1(%arg0: i32, %arg1: i32) -> (i32, i32, i32) {
    %c0_i32 = arith.constant 0 : i32
    %c0_i32_0 = arith.constant 0 : i32
    return %arg0, %arg1, %c0_i32 : i32, i32, i32
  }
  func.func @transform_2(%arg0: i32, %arg1: i32) -> (i32, i32) {
    %c0_i32 = arith.constant 0 : i32
    %c0_i32_0 = arith.constant 0 : i32
    %c0_i32_1 = arith.constant 0 : i32
    return %c0_i32, %c0_i32_0 : i32, i32
  }
  func.func @transform_3(%arg0: i32, %arg1: i32) -> (i32, i32) {
    %c0_i32 = arith.constant 0 : i32
    %c0_i32_0 = arith.constant 0 : i32
    %c0_i32_1 = arith.constant 0 : i32
    return %c0_i32, %c0_i32_0 : i32, i32
  }
  func.func @transform_4(%arg0: i32, %arg1: i32) -> (i32, i32) {
    %c0_i32 = arith.constant 0 : i32
    %c0_i32_0 = arith.constant 0 : i32
    return %arg0, %c0_i32 : i32, i32
  }
  func.func @transform_5(%arg0: i32, %arg1: i32) -> (i32, i32) {
    %c0_i32 = arith.constant 0 : i32
    %c0_i32_0 = arith.constant 0 : i32
    return %arg0, %c0_i32 : i32, i32
  }
  func.func @transform_6(%arg0: i32, %arg1: i32) -> (i32, i32) {
    %c0_i32 = arith.constant 0 : i32
    %c0_i32_0 = arith.constant 0 : i32
    return %arg0, %c0_i32 : i32, i32
  }
}

</mosaic_0001>

<bundles_post_ra>
// kernel: tpu_custom_call.1
= control target key start
LH: loop header
LB: loop body
LE: loop exit
PB: predicated region body
PF: predicated region fallthrough
CT: control target
= control target key end

     0   :  { %s1916_s0 = inlined_call_operand.vmem [shape: bf16[16,64,128], index: 0, kind: input, shape index: {}]   ;;  %s1917_s1 = inlined_call_operand.vmem [shape: f32[16,64,1], index: 1, kind: input, shape index: {}]   ;;  %s1918_s2 = inlined_call_operand.vmem [shape: f32[128,128], index: 2, kind: input, shape index: {}]   ;;  %s1919_s3 = inlined_call_operand.vmem [shape: f32[1,128], index: 3, kind: input, shape index: {}]   ;;  %s1920_s4 = inlined_call_operand.hbm [shape: f32[16,128], index: 4, kind: output, shape index: {0}]   ;;  %s1921_s5 = inlined_call_operand.hbm [shape: f32[16,128], index: 5, kind: output, shape index: {1}]   ;;  %s1922_s6 = inlined_call_operand.hbm [shape: f32[16,128], index: 6, kind: output, shape index: {2}]  }
   0x1   :  { %1931 = sst [smem:[#allocation16_spill]] %s1916_s0 }
   0x2   :  { %1932 = sst [smem:[#allocation17_spill]] %s1917_s1 }
   0x3   :  { %1933 = sst [smem:[#allocation18_spill]] %s1918_s2 }
   0x4   :  { %12 = vsyncpa [#allocation7], 0 }
   0x5   :  { %14 = vsyncpa [#allocation7 + $0x1], 0 }
   0x6   :  { %15 = vsyncpa [#allocation9], 0 }
   0x7   :  { %17 = vsyncpa [#allocation9 + $0x1], 0  ;;  %s1556_s21 = smov 0   ;;  %s1558_s22 = smov 0  }
   0x8   :  { %s1560_s23 = smov 0   ;;  %s1562_s24 = smov 0  }
   0x9   :  { %s1564_s25 = smov 0   ;;  %s1566_s26 = smov 0  }
   0xa   :  { %s1568_s27 = smov 0   ;;  %s1570_s28 = smov 0  }
   0xb   :  { %s1572_s29 = smov 0   ;;  %s1574_s30 = smov 0  }
   0xc LB: > { %s1924_s7 = sadd.s32 4294967295, %s1516_s30   ;;  %s1923_s8 = sadd.s32 4294967294, %s1516_s30   ;;  %s1516_s30 = sphi %s1574_s30, %s23_s30   ;;  %s1512_s29 = sphi %s1572_s29, %s1962_s29   ;;  %s1508_s28 = sphi %s1570_s28, %s1961_s28   ;;  %s1504_s27 = sphi %s1568_s27, %s1960_s27   ;;  %s1500_s26 = sphi %s1566_s26, %s1959_s26   ;;  %s1496_s25 = sphi %s1564_s25, %s1958_s25   ;;  %s1492_s24 = sphi %s1562_s24, %s1957_s24   ;;  %s1488_s23 = sphi %s1560_s23, %s1956_s23   ;;  %s1484_s22 = sphi %s1558_s22, %s1955_s22   ;;  %s1480_s21 = sphi %s1556_s21, %s1954_s21  }
   0xd   : > { %s32_s9 = sadd.s32 1, %s1508_s28  ;;  %s35_s10 = sadd.s32 1, %s1512_s29 }
   0xe   : > { %p33_p0 = scmp.ge.s32.totalorder %s32_s9, 4  ;;  %s44_s11 = sadd.s32 1, %s1496_s25 }
   0xf   : > { %p51_p1 = scmp.ne.s32.totalorder %s1496_s25, %s1492_s24  ;;  %p52_p2 = scmp.eq.s32.totalorder %s1516_s30, 0 }
  0x10   : > { %s1964_s9 = smov (%p33_p0, %s32_s9), 0  ;;  %s1966_s10 = smov (!%p33_p0, %s35_s10), %s1512_s29 }
  0x11   : > { %1934 = sst [smem:[#allocation13_spill]] %s1964_s9  ;;  %s40_s12 = ssub.s32 %s1508_s28, %s1964_s9 }
  0x12   : > { %p1619_p3 = por %p52_p2, %p51_p1  ;;  %p37_p4 = scmp.ge.s32.totalorder %s1966_s10, 2 }
  0x13   : > { %s140_s14 = sadd.s32 1, %s1488_s23  ;;  %p150_p5 = scmp.ne.s32.totalorder %s1488_s23, %s1484_s22 }
  0x14   : > { %p151_p6 = scmp.eq.s32.totalorder %s1924_s7, 7  ;;  %s1968_s10 = smov (%p37_p4, %s1966_s10), 0 }
  0x15   : > { %1936 = sst [smem:[#allocation14_spill]] %s1968_s10  ;;  %p156_p8 = scmp.ne.s32.totalorder %s1484_s22, %s1480_s21 }
  0x16   : > { %p1630_p7 = por %p151_p6, %p150_p5  ;;  %s39_s16 = ssub.s32 %s1512_s29, %s1968_s10 }
  0x17   : > { %p157_p9 = scmp.eq.s32.totalorder %s1923_s8, 7  ;;  %s41_s17 = sor.u32 %s40_s12, %s39_s16 }
  0x18   : > { %p138_p10 = scmp.eq.s32.totalorder %s39_s16, 0  ;;  %p42_p11 = scmp.eq.s32.totalorder %s41_s17, 0 }
  0x19   : > { %p1640_p12 = por %p157_p9, %p156_p8  ;;  %p1163_p13 = scmp.ge.s32.totalorder %s1516_s30, 8 }
  0x1a   : > { %s1645_s19 = scalar_select %p138_p10, %s1488_s23, %s140_s14  }
  0x1b   : > { %s1648_s20 = scalar_select %p42_p11, %s1496_s25, %s44_s11  }
  0x1c   : > { %231 = sbr.rel (%p1163_p13) target bundleno = 77 (0x4d), region = 24 }
  0x1d   : > { %1939 = sst [smem:[#allocation15_spill]] %s1648_s20 }
  0x21   : > { %234 = sbr.rel (!%p1619_p3) target bundleno = 51 (0x33), region = 28  ;;  %s236_s12 = sand.u32 (%p1619_p3), 1, %s1496_s25  }
  0x22   : > { %s1166_s16 = sshll.u32 (%p1619_p3), %s1508_s28, 1  ;;  %s1164_s17 = sshll.u32 (%p1619_p3), %s236_s12, 6 }
  0x23   : > { %s1190_s8 = sshll.u32 (%p1619_p3), %s1512_s29, 6  ;;  %s1940_s0 = sld [smem:[#allocation16_spill]] (%p1619_p3) }
  0x24   : > { %s242_s7 = sadd.s32 (%p1619_p3), %s1190_s8, %s1166_s16  ;;  %s238_s20 = scalar_lea.vmem (%p1619_p3), [#allocation4], %s1164_s17 }
  0x25   : > { %s1168_s10 = sshll.u32 (%p1619_p3), %s242_s7, 2 }
  0x29   : > { %s244_s11 = scalar_lea.vmem %s1940_s0, %s1168_s10 }
  0x2a   : > { %v261_v0 = vld [vmem:[%s244_s11] sm:$0xff]  }
  0x2b   : > { %v265_v1 = vld [vmem:[%s244_s11 + $0x20] sm:$0xff]   ;;  %262 = vst [vmem:[%s238_s20] sm:$0xff] %v261_v0  }
  0x2c   : > { %v269_v2 = vld [vmem:[%s244_s11 + $0x40] sm:$0xff]   ;;  %266 = vst [vmem:[%s238_s20 + $0x8] sm:$0xff] %v265_v1  }
  0x2d   : > { %v273_v3 = vld [vmem:[%s244_s11 + $0x60] sm:$0xff]   ;;  %270 = vst [vmem:[%s238_s20 + $0x10] sm:$0xff] %v269_v2  }
  0x2e   : > { %v277_v4 = vld [vmem:[%s244_s11 + $0x80] sm:$0xff]   ;;  %274 = vst [vmem:[%s238_s20 + $0x18] sm:$0xff] %v273_v3  }
  0x2f   : > { %v281_v5 = vld [vmem:[%s244_s11 + $0xa0] sm:$0xff]   ;;  %278 = vst [vmem:[%s238_s20 + $0x20] sm:$0xff] %v277_v4  }
  0x30   : > { %v285_v6 = vld [vmem:[%s244_s11 + $0xc0] sm:$0xff]   ;;  %282 = vst [vmem:[%s238_s20 + $0x28] sm:$0xff] %v281_v5  }
  0x31   : > { %v289_v7 = vld [vmem:[%s244_s11 + $0xe0] sm:$0xff]   ;;  %286 = vst [vmem:[%s238_s20 + $0x30] sm:$0xff] %v285_v6  }
  0x32   : > { %290 = vst [vmem:[%s238_s20 + $0x38] sm:$0xff] %v289_v7  }
  0x33 PF: > { %348 = sbr.rel (!%p1619_p3) target bundleno = 77 (0x4d), region = 69  ;;  %s350_s7 = sand.u32 (%p1619_p3), 1, %s1496_s25  }
  0x34   : > { %s1171_s8 = sshll.u32 (%p1619_p3), %s1508_s28, 1  ;;  %s1169_s9 = sshll.u32 (%p1619_p3), %s350_s7, 7 }
  0x35   : > { %s1191_s10 = sshll.u32 (%p1619_p3), %s1512_s29, 6  ;;  %s1941_s1 = sld [smem:[#allocation17_spill]] (%p1619_p3) }
  0x36   : > { %s356_s12 = sadd.s32 (%p1619_p3), %s1191_s10, %s1171_s8  ;;  %s352_s13 = scalar_lea.vmem (%p1619_p3), [#allocation5], %s1169_s9 }
  0x37   : > { %s1173_s16 = sshll.u32 (%p1619_p3), %s356_s12, 3 }
  0x3b   : > { %s1667_s11 = scalar_lea.vmem %s1941_s1, %s1173_s16 }
  0x3c   : > { %v417_v8 = vld [vmem:[%s1667_s11] sm:$0xff]  ;;  %v419_v9 = vld [vmem:[%s1667_s11 + $0x8] sm:$0xff] }
  0x3d   : > { %v421_v10 = vld [vmem:[%s1667_s11 + $0x40] sm:$0xff]  ;;  %418 = vst [vmem:[%s352_s13] sm:$0xff] %v417_v8  ;;  %v423_v11 = vld [vmem:[%s1667_s11 + $0x48] sm:$0xff] }
  0x3e   : > { %420 = vst [vmem:[%s352_s13 + $0x8] sm:$0xff] %v419_v9  ;;  %v425_v12 = vld [vmem:[%s1667_s11 + $0x80] sm:$0xff]  ;;  %v427_v13 = vld [vmem:[%s1667_s11 + $0x88] sm:$0xff] }
  0x3f   : > { %422 = vst [vmem:[%s352_s13 + $0x10] sm:$0xff] %v421_v10  ;;  %v429_v14 = vld [vmem:[%s1667_s11 + $0xc0] sm:$0xff]  ;;  %v431_v15 = vld [vmem:[%s1667_s11 + $0xc8] sm:$0xff] }
  0x40   : > { %424 = vst [vmem:[%s352_s13 + $0x18] sm:$0xff] %v423_v11  ;;  %v433_v16 = vld [vmem:[%s1667_s11 + $0x100] sm:$0xff]  ;;  %v435_v17 = vld [vmem:[%s1667_s11 + $0x108] sm:$0xff] }
  0x41   : > { %426 = vst [vmem:[%s352_s13 + $0x20] sm:$0xff] %v425_v12  ;;  %v437_v18 = vld [vmem:[%s1667_s11 + $0x140] sm:$0xff]  ;;  %v439_v19 = vld [vmem:[%s1667_s11 + $0x148] sm:$0xff] }
  0x42   : > { %428 = vst [vmem:[%s352_s13 + $0x28] sm:$0xff] %v427_v13  ;;  %v441_v20 = vld [vmem:[%s1667_s11 + $0x180] sm:$0xff]  ;;  %v443_v21 = vld [vmem:[%s1667_s11 + $0x188] sm:$0xff] }
  0x43   : > { %430 = vst [vmem:[%s352_s13 + $0x30] sm:$0xff] %v429_v14  ;;  %v445_v22 = vld [vmem:[%s1667_s11 + $0x1c0] sm:$0xff]  ;;  %v447_v23 = vld [vmem:[%s1667_s11 + $0x1c8] sm:$0xff] }
  0x44   : > { %432 = vst [vmem:[%s352_s13 + $0x38] sm:$0xff] %v431_v15 }
  0x45   : > { %434 = vst [vmem:[%s352_s13 + $0x40] sm:$0xff] %v433_v16 }
  0x46   : > { %436 = vst [vmem:[%s352_s13 + $0x48] sm:$0xff] %v435_v17 }
  0x47   : > { %438 = vst [vmem:[%s352_s13 + $0x50] sm:$0xff] %v437_v18 }
  0x48   : > { %440 = vst [vmem:[%s352_s13 + $0x58] sm:$0xff] %v439_v19 }
  0x49   : > { %442 = vst [vmem:[%s352_s13 + $0x60] sm:$0xff] %v441_v20 }
  0x4a   : > { %444 = vst [vmem:[%s352_s13 + $0x68] sm:$0xff] %v443_v21 }
  0x4b   : > { %446 = vst [vmem:[%s352_s13 + $0x70] sm:$0xff] %v445_v22 }
  0x4c   : > { %448 = vst [vmem:[%s352_s13 + $0x78] sm:$0xff] %v447_v23 }
  0x4d PF: > { %p1174_p0 = scmp.ge.s32.totalorder %s1516_s30, 1  ;;  %p453_p1 = scmp.lt.s32.totalorder %s1516_s30, 9 }
  0x4f   : > { %p454_p2 = pnand %p1174_p0, %p453_p1 }
  0x50   : > { %s460_s20 = sand.u32 (!%p454_p2), 1, %s1492_s24   ;;  %s1927_s7 = sand.u32 (!%p454_p2), 1, %s1484_s22  }
  0x51   : > { %457 = sbr.rel (%p454_p2) target bundleno = 827 (0x33b), region = 107  ;;  %s1175_s8 = sshll.u32 (!%p454_p2), %s460_s20, 6 }
  0x52   : > { %s1176_s9 = sshll.u32 (!%p454_p2), %s460_s20, 7  ;;  %s1691_s10 = sshll.u32 (!%p454_p2), %s1927_s7, 3 }
  0x53   : > { %s1693_s12 = scalar_lea.vmem (!%p454_p2), [#allocation4], %s1175_s8  ;;  %s1695_s16 = scalar_lea.vmem (!%p454_p2), [#allocation5], %s1176_s9 }
  0x54   : > { %s1929_s17 = scalar_lea.vmem (!%p454_p2), [#allocation6], %s1691_s10  ;;  %s1928_s11 = scalar_lea.vmem (!%p454_p2), [#allocation10], %s1691_s10 }
  0x55   : > { %p1180_p3 = scmp.ne.s32.totalorder (!%p454_p2), %s1500_s26, 0 }
  0x57   : > { %517 = sbr.rel (%p1180_p3) target bundleno = 95 (0x5f), region = 119 }
  0x5c   : > { %vm519_vm0 = vcmask 7168   ;;  %v1518_v24 = vmov 0.0  }
  0x5d   : > { %518 = vst [vmem:[#allocation2] sm:$0xff] %v1518_v24 }
  0x5e   : > { %520 = vst.msk [vmem:[#allocation3] sm:$0xff] %vm519_vm0, %v1518_v24 }
  0x5f PF: > { %v557_v25 = vld [vmem:[%s1695_s16 + $0x20] sm:$0xff]  ;;  %vm780_vm1 = vcmask 7168   ;;  %v555_v26 = vld [vmem:[%s1695_s16 + $0x10] sm:$0xff]  ;;  %v1519_v28 = vmov 0   ;;  %v558_v29 = vld [vmem:[%s1695_s16 + $0x28] sm:$0xff]  ;;  %vm762_vm0 = vcmask 1041409  }
  0x60   : > { %v553_v27 = vld [vmem:[%s1695_s16] sm:$0xff]  ;;  %1333 = vset.pattern.permute.xlu2 %v1519_v28  ;;  %1332 = vset.pattern.permute.xlu1 %v1519_v28  ;;  %vm573_vm2 = vcmp.lt.f32.partialorder %v557_v25, 0.0  ;;  %vm571_vm3 = vcmp.lt.f32.partialorder %v555_v26, 0.0  ;;  %v556_v30 = vld [vmem:[%s1695_s16 + $0x18] sm:$0xff]  ;;  %v554_v31 = vld [vmem:[%s1695_s16 + $0x8] sm:$0xff]  ;;  %vm574_vm5 = vcmp.lt.f32.partialorder %v558_v29, 0.0 }
  0x61   : > { %vm569_vm4 = vcmp.lt.f32.partialorder %v553_v27, 0.0  ;;  %1331 = vset.pattern.permute.xlu0 %v1519_v28  ;;  %v589_v32 = vsel %vm573_vm2, 0.0, %v557_v25  ;;  %v587_v33 = vsel %vm571_vm3, 0.0, %v555_v26  ;;  %v561_v35 = vld [vmem:[%s1695_s16 + $0x40] sm:$0xff]  ;;  %v590_v38 = vsel %vm574_vm5, 0.0, %v558_v29  ;;  %v560_v39 = vld [vmem:[%s1695_s16 + $0x38] sm:$0xff] }
  0x62   : > { %v585_v34 = vsel %vm569_vm4, 0.0, %v553_v27  ;;  %624 = vperm.xlu2 %1333, %v589_v32   ;;  %v799_v36 = vsel %vm780_vm1, %v589_v32, 0.0  ;;  %614 = vperm.xlu1 %1332, %v587_v33   ;;  %v790_v37 = vsel %vm780_vm1, %v587_v33, 0.0  ;;  %v800_v41 = vsel %vm780_vm1, %v590_v38, 0.0  ;;  %v559_v45 = vld [vmem:[%s1695_s16 + $0x30] sm:$0xff]  ;;  %v564_v46 = vld [vmem:[%s1695_s16 + $0x58] sm:$0xff] }
  0x63   : > { %604 = vperm.xlu0 %1331, %v585_v34   ;;  %v781_v40 = vsel %vm780_vm1, %v585_v34, 0.0  ;;  %vm572_vm6 = vcmp.lt.f32.partialorder %v556_v30, 0.0  ;;  %vm570_vm7 = vcmp.lt.f32.partialorder %v554_v31, 0.0  ;;  %v801_v42 = vadd.f32 %v800_v41, %v799_v36  ;;  %v563_v53 = vld [vmem:[%s1695_s16 + $0x50] sm:$0xff]  ;;  %v562_v54 = vld [vmem:[%s1695_s16 + $0x48] sm:$0xff]  ;;  %v565_v25 = vld [vmem:[%s1695_s16 + $0x60] sm:$0xff] }
  0x64   : > { %v588_v43 = vsel %vm572_vm6, 0.0, %v556_v30  ;;  %v586_v44 = vsel %vm570_vm7, 0.0, %v554_v31  ;;  %vm577_vm8 = vcmp.lt.f32.partialorder %v561_v35, 0.0  ;;  %vm576_vm9 = vcmp.lt.f32.partialorder %v560_v39, 0.0  ;;  %v566_v14 = vld [vmem:[%s1695_s16 + $0x68] sm:$0xff]  ;;  %v567_v18 = vld [vmem:[%s1695_s16 + $0x70] sm:$0xff] }
  0x65   : > { %v791_v47 = vsel %vm780_vm1, %v588_v43, 0.0  ;;  %v782_v48 = vsel %vm780_vm1, %v586_v44, 0.0  ;;  %v802_v49 = vrot.slane %v801_v42, 4  ;;  %v593_v52 = vsel %vm577_vm8, 0.0, %v561_v35  ;;  %v568_v34 = vld [vmem:[%s1695_s16 + $0x78] sm:$0xff]  ;;  %p1181_p4 = scmp.ne.s32.totalorder %s1500_s26, 3 }
  0x66   : > { %v792_v50 = vadd.f32 %v791_v47, %v790_v37  ;;  %v783_v51 = vadd.f32 %v782_v48, %v781_v40  ;;  %v817_v55 = vsel %vm780_vm1, %v593_v52, 0.0  ;;  %v592_v56 = vsel %vm576_vm9, 0.0, %v560_v39  ;;  %s1942_s2 = sld [smem:[#allocation18_spill]] (!%p1181_p4)  ;;  %s1943_s26 = scalar_lea.vmem (!%p1181_p4), [#allocation8], %s1691_s10 }
  0x67   : > { %vm575_vm10 = vcmp.lt.f32.partialorder %v559_v45, 0.0  ;;  %vm580_vm11 = vcmp.lt.f32.partialorder %v564_v46, 0.0  ;;  %v803_v57 = vadd.f32 %v802_v49, %v801_v42  ;;  %v809_v60 = vsel %vm780_vm1, %v592_v56, 0.0 }
  0x68   : > { %v793_v58 = vrot.slane %v792_v50, 4  ;;  %v784_v59 = vrot.slane %v783_v51, 4  ;;  %v591_v61 = vsel %vm575_vm10, 0.0, %v559_v45  ;;  %v1721_v62 = vsel %vm580_vm11, 0.0, %v564_v46 }
  0x69   : > { %vm579_vm12 = vcmp.lt.f32.partialorder %v563_v53, 0.0  ;;  %vm578_vm13 = vcmp.lt.f32.partialorder %v562_v54, 0.0  ;;  %v804_v63 = vrot.slane %v803_v57, 2  ;;  %v808_v2 = vsel %vm780_vm1, %v591_v61, 0.0 }
  0x6a   : > { %629 = vperm.xlu2 %1333, %v590_v38   ;;  %619 = vperm.xlu1 %1332, %v588_v43   ;;  %v794_v0 = vadd.f32 %v793_v58, %v792_v50  ;;  %v785_v1 = vadd.f32 %v784_v59, %v783_v51  ;;  %v810_v3 = vadd.f32 %v809_v60, %v808_v2  ;;  %v827_v4 = vsel %vm780_vm1, %v1721_v62, 0.0 }
  0x6b   : > { %609 = vperm.xlu0 %1331, %v586_v44   ;;  %v595_v5 = vsel %vm579_vm12, 0.0, %v563_v53  ;;  %v594_v6 = vsel %vm578_vm13, 0.0, %v562_v54  ;;  %v805_v7 = vadd.f32 %v804_v63, %v803_v57  ;;  %vm582_vm14 = vcmp.lt.f32.partialorder %v566_v14, 0.0 }
  0x6c   : > { %v795_v8 = vrot.slane %v794_v0, 2  ;;  %v786_v9 = vrot.slane %v785_v1, 2  ;;  %v826_v10 = vsel %vm780_vm1, %v595_v5, 0.0  ;;  %v811_v11 = vrot.slane %v810_v3, 4 }
  0x6d   : > { %v828_v12 = vadd.f32 %v827_v4, %v826_v10  ;;  %v818_v13 = vsel %vm780_vm1, %v594_v6, 0.0  ;;  %v806_v19 = vrot.slane %v805_v7, 1  ;;  %vm583_vm15 = vcmp.lt.f32.partialorder %v567_v18, 0.0 }
  0x6e   : > { %v796_v15 = vadd.f32 %v795_v8, %v794_v0  ;;  %v787_v16 = vadd.f32 %v786_v9, %v785_v1  ;;  %v819_v17 = vadd.f32 %v818_v13, %v817_v55  ;;  %v812_v20 = vadd.f32 %v811_v11, %v810_v3 }
  0x6f   : > { %v829_v21 = vrot.slane %v828_v12, 4  ;;  %v598_v33 = vsel %vm582_vm14, 0.0, %v566_v14  ;;  %vm581_vm2 = vcmp.lt.f32.partialorder %v565_v25, 0.0  ;;  %v807_v35 = vadd.f32 %v806_v19, %v805_v7  ;;  %v779_v7 = vld [vmem:[#allocation3] sm:$0xff]  ;;  %v1193_v19 = vld [vmem:[%s1693_s12] sm:$0xff]  }
  0x70   : > { %v797_v22 = vrot.slane %v796_v15, 1  ;;  %v788_v23 = vrot.slane %v787_v16, 1  ;;  %v820_v24 = vrot.slane %v819_v17, 4  ;;  %v813_v26 = vrot.slane %v812_v20, 2 }
  0x71   : > { %v830_v27 = vadd.f32 %v829_v21, %v828_v12  ;;  %v599_v37 = vsel %vm583_vm15, 0.0, %v567_v18  ;;  %v836_v38 = vsel %vm780_vm1, %v598_v33, 0.0  ;;  %v597_v42 = vsel %vm581_vm2, 0.0, %v565_v25 }
  0x72   : > { %v798_v28 = vadd.f32 %v797_v22, %v796_v15  ;;  %v789_v29 = vadd.f32 %v788_v23, %v787_v16  ;;  %644 = vperm.xlu2 %1333, %v593_v52   ;;  %639 = vperm.xlu1 %1332, %v592_v56   ;;  %v821_v30 = vadd.f32 %v820_v24, %v819_v17  ;;  %v844_v41 = vsel %vm780_vm1, %v599_v37, 0.0  ;;  %v1224_v15 = vld [vmem:[%s1693_s12 + $0x8] sm:$0xff]   ;;  %v1226_v22 = vld [vmem:[%s1693_s12 + $0x18] sm:$0xff]   ;;  %v1225_v23 = vld [vmem:[%s1693_s12 + $0x10] sm:$0xff]  }
  0x73   : > { %v814_v31 = vadd.f32 %v813_v26, %v812_v20  ;;  %634 = vperm.xlu0 %1331, %v591_v61   ;;  %v831_v32 = vrot.slane %v830_v27, 2  ;;  %v835_v45 = vsel %vm780_vm1, %v597_v42, 0.0  ;;  %vm584_vm3 = vcmp.lt.f32.partialorder %v568_v34, 0.0 }
  0x74   : > { %v822_v36 = vrot.slane %v821_v30, 2  ;;  %v861_v39 = vsel %vm762_vm0, %v798_v28, %v789_v29  ;;  %v837_v46 = vadd.f32 %v836_v38, %v835_v45  ;;  %v600_v47 = vsel %vm584_vm3, 0.0, %v568_v34 }
  0x75   : > { %v815_v40 = vrot.slane %v814_v31, 1  ;;  %v832_v43 = vadd.f32 %v831_v32, %v830_v27  ;;  %vm764_vm4 = vcmask 1042434   ;;  %v845_v50 = vsel %vm780_vm1, %v600_v47, 0.0 }
  0x76   : > { %v823_v44 = vadd.f32 %v822_v36, %v821_v30  ;;  %v862_v51 = vsel %vm764_vm4, %v807_v35, %v861_v39  ;;  %v838_v52 = vrot.slane %v837_v46, 4  ;;  %v846_v53 = vadd.f32 %v845_v50, %v844_v41  ;;  %v1227_v36 = vld [vmem:[%s1693_s12 + $0x20] sm:$0xff]  }
  0x77   : > { %v816_v48 = vadd.f32 %v815_v40, %v814_v31  ;;  %v833_v54 = vrot.slane %v832_v43, 1  ;;  %vm766_vm5 = vcmask 1043459   ;;  %vm768_vm6 = vcmask 1044484  }
  0x78   : > { %v824_v49 = vrot.slane %v823_v44, 1  ;;  %v839_v56 = vadd.f32 %v838_v52, %v837_v46  ;;  %v847_v57 = vrot.slane %v846_v53, 4  ;;  %vm770_vm7 = vcmask 1045509  }
  0x79   : > { %v863_v58 = vsel %vm766_vm5, %v816_v48, %v862_v51  ;;  %v834_v61 = vadd.f32 %v833_v54, %v832_v43  ;;  %vm772_vm8 = vcmask 1046534   ;;  %vm774_vm9 = vcmask 1047559  }
  0x7a   : > { %659 = vperm.xlu2 %1333, %v1721_v62   ;;  %654 = vperm.xlu1 %1332, %v595_v5   ;;  %v825_v55 = vadd.f32 %v824_v49, %v823_v44  ;;  %v840_v59 = vrot.slane %v839_v56, 2  ;;  %v848_v60 = vadd.f32 %v847_v57, %v846_v53  ;;  %v1198_v18 = vunpack.c.l.bf16 %v1224_v15 }
  0x7b   : > { %649 = vperm.xlu0 %1331, %v594_v6   ;;  %v1199_v20 = vunpack.c.h.bf16 %v1224_v15  ;;  %v1195_v21 = vunpack.c.h.bf16 %v1193_v19  ;;  %v1194_v24 = vunpack.c.l.bf16 %v1193_v19  ;;  %v1207_v30 = vunpack.c.h.bf16 %v1226_v22  ;;  %v1230_v15 = vld [vmem:[%s1693_s12 + $0x38] sm:$0xff]  }
  0x7c   : > { %v864_v63 = vsel %vm768_vm6, %v825_v55, %v863_v58  ;;  %v841_v0 = vadd.f32 %v840_v59, %v839_v56  ;;  %v849_v1 = vrot.slane %v848_v60, 2  ;;  %v1206_v31 = vunpack.c.l.bf16 %v1226_v22  ;;  %v1229_v59 = vld [vmem:[%s1693_s12 + $0x30] sm:$0xff]  }
  0x7d   : > { %v865_v3 = vsel %vm770_vm7, %v834_v61, %v864_v63  ;;  %v1202_v32 = vunpack.c.l.bf16 %v1225_v23  ;;  %v1210_v45 = vunpack.c.l.bf16 %v1227_v36 }
  0x7e   : > { %v842_v2 = vrot.slane %v841_v0, 1  ;;  %v850_v62 = vadd.f32 %v849_v1, %v848_v60 }
  0x80   : > { %v843_v4 = vadd.f32 %v842_v2, %v841_v0  ;;  %v851_v5 = vrot.slane %v850_v62, 1 }
  0x82   : > { %674 = vperm.xlu2 %1333, %v599_v37   ;;  %669 = vperm.xlu1 %1332, %v598_v33   ;;  %v866_v6 = vsel %vm772_vm8, %v843_v4, %v865_v3  ;;  %v852_v8 = vadd.f32 %v851_v5, %v850_v62  ;;  %v1203_v33 = vunpack.c.h.bf16 %v1225_v23  ;;  %v1228_v37 = vld [vmem:[%s1693_s12 + $0x28] sm:$0xff]   ;;  %v1219_v62 = vunpack.c.h.bf16 %v1229_v59 }
  0x83   : > { %664 = vperm.xlu0 %1331, %v597_v42   ;;  %v1214_v44 = vunpack.c.l.bf16 %v1228_v37  ;;  %v1215_v46 = vunpack.c.h.bf16 %v1228_v37  ;;  %v1218_v4 = vunpack.c.l.bf16 %v1229_v59  ;;  %v1222_v23 = vunpack.c.l.bf16 %v1230_v15 }
  0x84   : > { %v867_v9 = vsel %vm774_vm9, %v852_v8, %v866_v6 }
  0x85   : > { %v869_v10 = vadd.f32 %v867_v9, %v779_v7 }
  0x87   : > { %870 = vst.msk [vmem:[#allocation3] sm:$0xff] %vm780_vm1, %v869_v10 }
  0x8b   : > { %679 = vperm.xlu0 %1331, %v600_v47   ;;  %v1211_v47 = vunpack.c.h.bf16 %v1227_v36 }
  0xbc   : > { %v625_v11 = vpop.permute.xlu2 %624 }
  0xbd   : > { %v686_v42 = vmul.f32 %v1202_v32, %v625_v11 }
  0xc4   : > { %v630_v14 = vpop.permute.xlu2 %629 }
  0xc5   : > { %v687_v43 = vmul.f32 %v1203_v33, %v630_v14 }
  0xc7   : > { %v712_v52 = vadd.f32 %v687_v43, %v686_v42 }
  0xc9   : > { %v713_v2 = vrot.slane %v712_v52, 4 }
  0xcb   : > { %v714_v10 = vadd.f32 %v713_v2, %v712_v52 }
  0xcc   : > { %v645_v25 = vpop.permute.xlu2 %644 }
  0xcd   : > { %v690_v56 = vmul.f32 %v1210_v45, %v645_v25  ;;  %v1223_v25 = vunpack.c.h.bf16 %v1230_v15 }
  0xd4   : > { %v615_v12 = vpop.permute.xlu1 %614  ;;  %v660_v53 = vpop.permute.xlu2 %659 }
  0xd5   : > { %v605_v13 = vpop.permute.xlu0 %604  ;;  %v684_v26 = vmul.f32 %v1198_v18, %v615_v12  ;;  %v693_v57 = vmul.f32 %v1215_v46, %v660_v53 }
  0xd6   : > { %v682_v35 = vmul.f32 %v1194_v24, %v605_v13 }
  0xdc   : > { %v620_v16 = vpop.permute.xlu1 %619 }
  0xdd   : > { %v610_v17 = vpop.permute.xlu0 %609  ;;  %v685_v27 = vmul.f32 %v1199_v20, %v620_v16 }
  0xde   : > { %v683_v28 = vmul.f32 %v1195_v21, %v610_v17  ;;  %v715_v21 = vrot.slane %v714_v10, 2 }
  0xdf   : > { %v705_v38 = vadd.f32 %v685_v27, %v684_v26  ;;  %v675_v26 = vpop.permute.xlu2 %674 }
  0xe0   : > { %v698_v39 = vadd.f32 %v683_v28, %v682_v35  ;;  %v716_v32 = vadd.f32 %v715_v21, %v714_v10  ;;  %v696_v35 = vmul.f32 %v1222_v23, %v675_v26 }
  0xe1   : > { %v706_v48 = vrot.slane %v705_v38, 4 }
  0xe2   : > { %v699_v49 = vrot.slane %v698_v39, 4  ;;  %v717_v43 = vrot.slane %v716_v32, 1 }
  0xe3   : > { %v707_v60 = vadd.f32 %v706_v48, %v705_v38 }
  0xe4   : > { %v640_v29 = vpop.permute.xlu1 %639  ;;  %v700_v61 = vadd.f32 %v699_v49, %v698_v39 }
  0xe5   : > { %v635_v34 = vpop.permute.xlu0 %634  ;;  %v689_v40 = vmul.f32 %v1207_v30, %v640_v29  ;;  %v708_v5 = vrot.slane %v707_v60, 2 }
  0xe6   : > { %v688_v41 = vmul.f32 %v1206_v31, %v635_v34  ;;  %v701_v6 = vrot.slane %v700_v61, 2 }
  0xe7   : > { %v709_v16 = vadd.f32 %v708_v5, %v707_v60 }
  0xe8   : > { %v719_v50 = vadd.f32 %v689_v40, %v688_v41  ;;  %v702_v17 = vadd.f32 %v701_v6, %v700_v61 }
  0xe9   : > { %v710_v27 = vrot.slane %v709_v16, 1 }
  0xea   : > { %v720_v63 = vrot.slane %v719_v50, 4  ;;  %v703_v28 = vrot.slane %v702_v17, 1 }
  0xeb   : > { %v711_v38 = vadd.f32 %v710_v27, %v709_v16 }
  0xec   : > { %v655_v51 = vpop.permute.xlu1 %654  ;;  %v721_v7 = vadd.f32 %v720_v63, %v719_v50  ;;  %v704_v39 = vadd.f32 %v703_v28, %v702_v17 }
  0xed   : > { %v692_v54 = vmul.f32 %v1214_v44, %v655_v51  ;;  %v650_v55 = vpop.permute.xlu0 %649  ;;  %v718_v51 = vadd.f32 %v717_v43, %v716_v32 }
  0xee   : > { %v691_v58 = vmul.f32 %v1211_v47, %v650_v55  ;;  %v722_v18 = vrot.slane %v721_v7, 2  ;;  %v763_v47 = vsel %vm762_vm0, %v711_v38, %v704_v39 }
  0xef   : > { %v733_v0 = vadd.f32 %v693_v57, %v692_v54  ;;  %v765_v55 = vsel %vm764_vm4, %v718_v51, %v763_v47 }
  0xf0   : > { %v726_v1 = vadd.f32 %v691_v58, %v690_v56  ;;  %v723_v29 = vadd.f32 %v722_v18, %v721_v7 }
  0xf1   : > { %v734_v8 = vrot.slane %v733_v0, 4 }
  0xf2   : > { %v727_v3 = vrot.slane %v726_v1, 4  ;;  %v724_v40 = vrot.slane %v723_v29, 1 }
  0xf3   : > { %v735_v19 = vadd.f32 %v734_v8, %v733_v0  ;;  %v601_v0 = vld [vmem:[#allocation2] sm:$0xff] }
  0xf4   : > { %v670_v9 = vpop.permute.xlu1 %669  ;;  %v728_v11 = vadd.f32 %v727_v3, %v726_v1  ;;  %v725_v48 = vadd.f32 %v724_v40, %v723_v29 }
  0xf5   : > { %v695_v12 = vmul.f32 %v1219_v62, %v670_v9  ;;  %v665_v13 = vpop.permute.xlu0 %664  ;;  %v736_v30 = vrot.slane %v735_v19, 2 }
  0xf6   : > { %v694_v14 = vmul.f32 %v1218_v4, %v665_v13  ;;  %v729_v22 = vrot.slane %v728_v11, 2  ;;  %v767_v56 = vsel %vm766_vm5, %v725_v48, %v765_v55 }
  0xf7   : > { %v737_v41 = vadd.f32 %v736_v30, %v735_v19 }
  0xf8   : > { %v740_v20 = vadd.f32 %v695_v12, %v694_v14  ;;  %v730_v33 = vadd.f32 %v729_v22, %v728_v11 }
  0xf9   : > { %v738_v49 = vrot.slane %v737_v41, 1 }
  0xfa   : > { %v741_v24 = vrot.slane %v740_v20, 4  ;;  %v731_v44 = vrot.slane %v730_v33, 1 }
  0xfb   : > { %v739_v57 = vadd.f32 %v738_v49, %v737_v41 }
  0xfc   : > { %v742_v31 = vadd.f32 %v741_v24, %v740_v20  ;;  %v732_v52 = vadd.f32 %v731_v44, %v730_v33 }
  0xfd   : > { %v680_v34 = vpop.permute.xlu0 %679 }
  0xfe   : > { %v743_v36 = vrot.slane %v742_v31, 2  ;;  %v697_v37 = vmul.f32 %v1223_v25, %v680_v34  ;;  %v769_v59 = vsel %vm768_vm6, %v732_v52, %v767_v56 }
  0xff   : > { %v771_v63 = vsel %vm770_vm7, %v739_v57, %v769_v59 }
 0x100   : > { %v747_v42 = vadd.f32 %v697_v37, %v696_v35  ;;  %v744_v45 = vadd.f32 %v743_v36, %v742_v31 }
 0x102   : > { %v748_v46 = vrot.slane %v747_v42, 4  ;;  %v745_v53 = vrot.slane %v744_v45, 1 }
 0x104   : > { %v749_v50 = vadd.f32 %v748_v46, %v747_v42  ;;  %v746_v60 = vadd.f32 %v745_v53, %v744_v45 }
 0x106   : > { %v750_v54 = vrot.slane %v749_v50, 2  ;;  %v773_v2 = vsel %vm772_vm8, %v746_v60, %v771_v63 }
 0x108   : > { %v751_v58 = vadd.f32 %v750_v54, %v749_v50 }
 0x10a   : > { %v752_v61 = vrot.slane %v751_v58, 1 }
 0x10c   : > { %v753_v1 = vadd.f32 %v752_v61, %v751_v58 }
 0x10d   : > { %874 = sbr.rel (%p1181_p4) target bundleno = 782 (0x30e), region = 123 }
 0x10e   : > { %v775_v62 = vsel %vm774_vm9, %v753_v1, %v773_v2 }
 0x10f   : > { %v777_v3 = vadd.f32 %v775_v62, %v601_v0 }
 0x111   : > { %778 = vst [vmem:[#allocation2] sm:$0xff] %v777_v3 }
 0x112   : > { %v875_v4 = vld [vmem:[#allocation3] sm:$0xff]  ;;  %v900_v5 = vld [vmem:[%s1942_s2 + $0x78] sm:$0xff]  ;;  %v899_v6 = vld [vmem:[%s1942_s2 + $0x70] sm:$0xff]  ;;  %v1520_v7 = vmov 0  }
 0x113   : > { %1334 = vset.pattern.permute.xlu0 %v1520_v7  ;;  %v876_v8 = vmax.f32 %v875_v4, 1e-09  ;;  %905 = vmatpush.msra.mxu0 %v900_v5  ;;  %v898_v9 = vld [vmem:[%s1942_s2 + $0x68] sm:$0xff]  ;;  %v897_v10 = vld [vmem:[%s1942_s2 + $0x60] sm:$0xff]  ;;  %v896_v11 = vld [vmem:[%s1942_s2 + $0x58] sm:$0xff] }
 0x114   : > { %v895_v12 = vld [vmem:[%s1942_s2 + $0x50] sm:$0xff]  ;;  %v894_v14 = vld [vmem:[%s1942_s2 + $0x48] sm:$0xff]  ;;  %v893_v15 = vld [vmem:[%s1942_s2 + $0x40] sm:$0xff] }
 0x115   : > { %1336 = vrcp.f32 %v876_v8  ;;  %906 = vmatpush.msra.mxu0 %v899_v6  ;;  %v892_v16 = vld [vmem:[%s1942_s2 + $0x38] sm:$0xff]  ;;  %v891_v17 = vld [vmem:[%s1942_s2 + $0x30] sm:$0xff]  ;;  %v890_v18 = vld [vmem:[%s1942_s2 + $0x28] sm:$0xff] }
 0x116   : > { %v889_v19 = vld [vmem:[%s1942_s2 + $0x20] sm:$0xff]  ;;  %v888_v20 = vld [vmem:[%s1942_s2 + $0x18] sm:$0xff]  ;;  %v887_v21 = vld [vmem:[%s1942_s2 + $0x10] sm:$0xff] }
 0x117   : > { %907 = vmatpush.msra.mxu0 %v898_v9  ;;  %v886_v22 = vld [vmem:[%s1942_s2 + $0x8] sm:$0xff]  ;;  %v885_v23 = vld [vmem:[%s1942_s2] sm:$0xff] }
 0x118   : > { %v878_v24 = vld [vmem:[#allocation2] sm:$0xff] }
 0x119   : > { %908 = vmatpush.msra.mxu0 %v897_v10  ;;  %v1335_v27 = vld [vmem:[%s1919_s3] ss:$0 sm:$0xff] }
 0x11b   : > { %v1337_v13 = vpop.eup %1336  ;;  %909 = vmatpush.msra.mxu0 %v896_v11 }
 0x11c   : > { %881 = vperm.xlu0 %1334, %v1337_v13  }
 0x11d   : > { %910 = vmatpush.msra.mxu0 %v895_v12 }
 0x11f   : > { %911 = vmatpush.msra.mxu0 %v894_v14 }
 0x121   : > { %912 = vmatpush.msra.mxu0 %v893_v15 }
 0x123   : > { %913 = vmatpush.msra.mxu0 %v892_v16 }
 0x125   : > { %914 = vmatpush.msra.mxu0 %v891_v17 }
 0x127   : > { %915 = vmatpush.msra.mxu0 %v890_v18 }
 0x129   : > { %916 = vmatpush.msra.mxu0 %v889_v19 }
 0x12b   : > { %917 = vmatpush.msra.mxu0 %v888_v20 }
 0x12d   : > { %918 = vmatpush.msra.mxu0 %v887_v21 }
 0x12f   : > { %919 = vmatpush.msra.mxu0 %v886_v22 }
 0x131   : > { %920 = vmatpush.msra.mxu0 %v885_v23 }
 0x18e   : > { %v882_v25 = vpop.permute.xlu0 %881 }
 0x18f   : > { %v884_v26 = vmul.f32 %v882_v25, %v878_v24 }
 0x191   : > { %921 = vmatmul.f32.vlgmr.msra.gmra.mxu0 %v884_v26 }
 0x20e   : > { %v922_v28 = vpop.f32.mrf.mxu0 }
 0x20f   : > { %v923_v29 = vadd.f32 %v1335_v27, %v922_v28 }
 0x211   : > { %925 = vst [vmem:[%s1929_s17] sm:$0xff] %v923_v29  ;;  %v936_v30 = vsub.f32 0.0, %v923_v29  ;;  %926 = vmax.xlane.f32.xlu0 %v923_v29 }
 0x213   : > { %v937_v31 = vmin.f32 %v936_v30, 60.0 }
 0x215   : > { %v938_v32 = vmul.f32 1.442695, %v937_v31 }
 0x217   : > { %1338 = vpow2.f32 %v938_v32 }
 0x21d   : > { %v1339_v33 = vpop.eup %1338 }
 0x21e   : > { %v940_v34 = vadd.f32 1.0, %v1339_v33 }
 0x220   : > { %1340 = vrcp.f32 %v940_v34 }
 0x226   : > { %v1341_v35 = vpop.eup %1340 }
 0x227   : > { %942 = vst [vmem:[%s1928_s11] sm:$0xff] %v1341_v35 }
 0x284   : > { %v927_v36 = vpop.xlane.xlu0 %926 }
 0x285   : > { %v928_v37 = vsub.f32 %v923_v29, %v927_v36 }
 0x287   : > { %v929_v38 = vmul.f32 1.442695, %v928_v37 }
 0x289   : > { %1342 = vpow2.f32 %v929_v38 }
 0x28f   : > { %v1343_v39 = vpop.eup %1342 }
 0x290   : > { %931 = vadd.xlane.f32.xlu1 %v1343_v39 }
 0x303   : > { %v932_v40 = vpop.xlane.xlu1 %931 }
 0x304   : > { %1344 = vrcp.f32 %v932_v40 }
 0x30a   : > { %v1345_v41 = vpop.eup %1344 }
 0x30b   : > { %v934_v42 = vmul.f32 %v1345_v41, %v1343_v39 }
 0x30d   : > { %935 = vst [vmem:[%s1943_s26] sm:$0xff] %v934_v42 }
 0x30e PF: > { %s1944_s16 = sadd.s32 4294967295, %s1516_s30   ;;  %s1823_s13 = sshll.u32 %s1504_s27, 3 }
 0x30f   : > { %s1820_s24 = sand.u32 1, %s1944_s16   ;;  %s978_s14 = scalar_lea.hbm %s1921_s5, %s1823_s13 }
 0x310   : > { %s1945_s8 = scalar_lea.vmem [#allocation8], %s1691_s10  ;;  %s982_s12 = sshll.u32 %s978_s14, 4  ;;  %s983_s12 = int_to_ptr.hbm [resolvable:$true] %s982_s12 }
 0x311   : > { %s980_s9 = sshll.u32 %s1945_s8, 4  ;;  %s1930_s26 = scalar_lea.sflag [#allocation9], %s1820_s24  ;;  %s981_s9 = int_to_ptr.vmem [resolvable:$true] %s980_s9 }
 0x312   : > { %s1360_s11 = sshra.s32 %s983_s12, 4  ;;  %s1366_s0 = scalar_lea.hbm %s1921_s5, 16  ;;  %s1361_s11 = int_to_ptr.hbm [resolvable:$true] %s1360_s11 }
 0x313   : > { %s1362_s17 = scalar_lea.hbm %s1361_s11, 8  ;;  %p1367_p9 = scmp.lt.s32.totalorder %s1361_s11, %s1921_s5 }
 0x314   : > { %p1363_p5 = scmp.ne.s32.totalorder %s1361_s11, %s1362_s17  ;;  %p1368_p10 = scmp.lt.s32.totalorder %s1366_s0, %s1362_s17 }
 0x316   : > { %p1364_p6 = pnand %p1363_p5, %p1630_p7  ;;  %p1369_p11 = por %p1368_p10, %p1367_p9 }
 0x318   : > { %p1365_p8 = pneg %p1364_p6 }
 0x31a   : > { %p1370_p13 = pnand %p1369_p11, %p1365_p8 }
 0x31c   : > { %1373 = shalt.err (!%p1370_p13)
}
 0x31d   : > { %1232 = dma.vmem_to_hbm [thread:$0]  (%p1630_p7), %s981_s9, 128, %s983_s12, %s1930_s26  }
 0x31e   : > { %s964_s8 = scalar_lea.hbm %s1920_s4, %s1823_s13  ;;  %s1946_s27 = scalar_lea.vmem [#allocation6], %s1691_s10 }
 0x31f   : > { %s966_s1 = sshll.u32 %s1946_s27, 4  ;;  %s968_s11 = sshll.u32 %s964_s8, 4  ;;  %s967_s1 = int_to_ptr.vmem [resolvable:$true] %s966_s1  ;;  %s969_s11 = int_to_ptr.hbm [resolvable:$true] %s968_s11 }
 0x320   : > { %s1947_s0 = sand.u32 1, %s1484_s22   ;;  %s1388_s16 = sshra.s32 %s969_s11, 4  ;;  %s1389_s16 = int_to_ptr.hbm [resolvable:$true] %s1388_s16 }
 0x321   : > { %s944_s17 = scalar_lea.sflag [#allocation7], %s1947_s0  ;;  %s1390_s20 = scalar_lea.hbm %s1389_s16, 8 }
 0x322   : > { %p1391_p0 = scmp.ne.s32.totalorder %s1389_s16, %s1390_s20  ;;  %s1394_s12 = scalar_lea.hbm %s1920_s4, 16 }
 0x323   : > { %p1395_p3 = scmp.lt.s32.totalorder %s1389_s16, %s1920_s4  ;;  %p1396_p4 = scmp.lt.s32.totalorder %s1394_s12, %s1390_s20 }
 0x324   : > { %p1392_p1 = pnand %p1391_p0, %p1630_p7 }
 0x325   : > { %p1397_p5 = por %p1396_p4, %p1395_p3 }
 0x326   : > { %p1393_p2 = pneg %p1392_p1 }
 0x328   : > { %p1398_p6 = pnand %p1397_p5, %p1393_p2 }
 0x32a   : > { %1401 = shalt.err (!%p1398_p6)
}
 0x32b   : > { %1231 = dma.vmem_to_hbm [thread:$0]  (%p1630_p7), %s967_s1, 128, %s969_s11, %s944_s17  }
 0x32c   : > { %s992_s0 = scalar_lea.hbm %s1922_s6, %s1823_s13  ;;  %s1948_s2 = scalar_lea.vmem [#allocation10], %s1691_s10 }
 0x32d   : > { %s994_s9 = sshll.u32 %s1948_s2, 4  ;;  %s996_s26 = sshll.u32 %s992_s0, 4  ;;  %s995_s9 = int_to_ptr.vmem [resolvable:$true] %s994_s9  ;;  %s997_s26 = int_to_ptr.hbm [resolvable:$true] %s996_s26 }
 0x32e   : > { %s1416_s16 = sshra.s32 %s997_s26, 4  ;;  %s1422_s1 = scalar_lea.hbm %s1922_s6, 16  ;;  %s1417_s16 = int_to_ptr.hbm [resolvable:$true] %s1416_s16 }
 0x32f   : > { %s1418_s20 = scalar_lea.hbm %s1417_s16, 8  ;;  %p1423_p11 = scmp.lt.s32.totalorder %s1417_s16, %s1922_s6 }
 0x330   : > { %p1419_p8 = scmp.ne.s32.totalorder %s1417_s16, %s1418_s20  ;;  %p1424_p13 = scmp.lt.s32.totalorder %s1422_s1, %s1418_s20 }
 0x332   : > { %p1420_p9 = pnand %p1419_p8, %p1630_p7  ;;  %p1425_p0 = por %p1424_p13, %p1423_p11 }
 0x334   : > { %p1421_p10 = pneg %p1420_p9 }
 0x336   : > { %p1426_p1 = pnand %p1425_p0, %p1421_p10 }
 0x338   : > { %1429 = shalt.err (!%p1426_p1)
}
 0x339   : > { %s1949_s10 = scalar_lea.sflag [#allocation9], %s1820_s24 }
 0x33a   : > { %1233 = dma.vmem_to_hbm [thread:$0]  (%p1630_p7), %s995_s9, 128, %s997_s26, %s1949_s10  }
 0x33b PF: > { %p1247_p2 = scmp.ge.s32.totalorder %s1516_s30, 2  ;;  %s1008_s13 = sand.u32 1, %s1480_s21  }
 0x33c   : > { %s1009_s14 = scalar_lea.sflag [#allocation7], %s1008_s13 }
 0x33d   : > { %p1238_p3 = pnand %p1247_p2, %p1640_p12 }
 0x33f   : > { %p1239_p4 = pneg %p1238_p3 }
 0x341   : > { %1471 = dma.done.wait (%p1239_p4), %s1009_s14, 128  }
 0x342   : > { %1473 = vsyncadd (%p1239_p4), %s1009_s14, 4294967168  ;;  %s1950_s8 = sadd.s32 4294967294, %s1516_s30  }
 0x343   : > { %s1018_s27 = sand.u32 1, %s1950_s8  }
 0x344   : > { %s1019_s0 = scalar_lea.sflag [#allocation9], %s1018_s27 }
 0x345   : > { %1475 = dma.done.wait (%p1239_p4), %s1019_s0, 256  }
 0x346   : > { %1477 = vsyncadd (%p1239_p4), %s1019_s0, 4294967040  ;;  %s23_s30 = sadd.s32 1, %s1516_s30   ;;  %s1951_s15 = sld [smem:[#allocation15_spill]] }
 0x347   : > { %p20_p7 = scmp.ge.s32.totalorder %s23_s30, 10   ;;  %s1952_s18 = sld [smem:[#allocation13_spill]] }
 0x348   : > { %s1953_s2 = sld [smem:[#allocation14_spill]]  ;;  %s1954_s21 = smov %s1484_s22 }
 0x349   : > { %s1955_s22 = smov %s1488_s23  ;;  %s1956_s23 = smov %s1645_s19 }
 0x34a   : > { %s1957_s24 = smov %s1496_s25  ;;  %s1959_s26 = smov %s1508_s28 }
 0x34b   : > { %s1960_s27 = smov %s1512_s29  ;;  %22 = sbr.rel (!%p20_p7) target bundleno = 12 (0xc), region = 203 }
 0x34c   : > { %s1958_s25 = smov %s1951_s15 }
 0x34d   : > { %s1961_s28 = smov %s1952_s18 }
 0x34e   : > { %s1962_s29 = smov %s1953_s2 }
 0x350   :  { %1035 = vsyncpa [#allocation7], 1 }
 0x351   :  { %1037 = vsyncpa [#allocation7 + $0x1], 1 }
 0x352   :  { %1038 = vsyncpa [#allocation9], 1 }
 0x353   :  { %1040 = vsyncpa [#allocation9 + $0x1], 1 }

</bundles_post_ra>
